<compile_context>
chip_gen: v7x
topology: tpu7x:2x2x1
jax: 0.10.0
libtpu: 0.0.40
codegen_flags: <defaults>
</compile_context>

<pallas_src>
import functools

import jax
import jax.numpy as jnp
from jax import lax
from jax.experimental import pallas as pl
from jax.experimental.pallas import tpu as pltpu

EPS = 1e-12
_SUB_TM = 128                 # in-kernel sub-tile rows (f32 acc = 16 vregs)
_LANE = 128
_MIB = 1024 * 1024


def _round_up(a, b):
    return ((a + b - 1) // b) * b


# ---------------------------------------------------------------------------
# Pallas kernel: implicit-GEMM conv  +  1/sigma scale  +  bias
# ---------------------------------------------------------------------------
def _snconv_kernel(inv_sigma_ref, x_ref, w_ref, b_ref, o_ref, *,
                   tap_offsets, sub_tm, n_sub):
    # inv_sigma_ref : (1, 1)             f32   SMEM
    # x_ref         : (1, hwp, K)        bf16  whole (padded/packed) image rows
    # w_ref         : (T, K, cout_pad)   bf16  VMEM-resident weight taps
    # b_ref         : (1, cout_pad)      f32
    # o_ref         : (1, tm, cout_pad)  bf16
    tm = sub_tm * n_sub
    base = pl.multiple_of(pl.program_id(1) * tm, 8)
    inv_sigma = inv_sigma_ref[0, 0]
    bias = b_ref[...]                                   # (1, cout_pad) f32

    def sub_tile(s, carry):
        # Small per-sub-tile accumulator lives in vregs; the fori_loop bounds
        # its live range (no cross-sub-tile spill traffic).
        sub0 = pl.multiple_of(s * sub_tm, 8)
        r0 = base + sub0
        acc = None
        for k, off in enumerate(tap_offsets):           # KH (packed) or KH*KW
            start = r0 + off
            if off % 8 == 0:                            # sublane-aligned tap
                start = pl.multiple_of(start, 8)
            xs = x_ref[0, pl.ds(start, sub_tm), :]      # (sub_tm, K) bf16 view
            d = jnp.dot(xs, w_ref[k], preferred_element_type=jnp.float32)
            acc = d if acc is None else acc + d
        out = acc * inv_sigma + bias                    # single VPU epilogue
        o_ref[0, pl.ds(sub0, sub_tm), :] = out.astype(o_ref.dtype)
        return carry

    lax.fori_loop(0, n_sub, sub_tile, 0)


# ---------------------------------------------------------------------------
# Wrapper
# ---------------------------------------------------------------------------
def snconv2d_forward(x, weight, bias, u, *, tm=512, eps=EPS,
                     out_dtype=jnp.float32):
    """Spectral-norm Conv2d forward (stride=1, padding=0, dilation=1, groups=1).

    x: (N, Cin, H, W); weight: (Cout, Cin, KH, KW); bias: (Cout,);
    u: (Cout,) persistent power-iteration vector.
    Returns (y, u_new): y is (N, Cout, OH, OW), u_new the updated u.
    """
    N, Cin, H, W = x.shape
    Cout, _, KH, KW = weight.shape
    OH, OW = H - KH + 1, W - KW + 1

    # ---- spectral norm: one power iteration (two tiny GEMVs, plain JAX) ----
    w_mat = weight.reshape(Cout, Cin * KH * KW).astype(jnp.float32)
    v = w_mat.T @ u.astype(jnp.float32)
    v = v / jnp.maximum(jnp.linalg.norm(v), eps)
    wv = w_mat @ v
    u_new = wv / jnp.maximum(jnp.linalg.norm(wv), eps)
    sigma = jnp.dot(u_new, wv)
    inv_sigma = (1.0 / jnp.maximum(sigma, eps)).reshape(1, 1).astype(jnp.float32)

    # ---- layout prep (single cheap pass; fuses transpose+pad+cast in XLA) --
    # Lane-dense output; pad Cout to 256 when Cout > 128 so the 2x256-wide
    # v6e/v7x MXUs are fully fed (v5e over-pads slightly there; acceptable).
    cout_pad = _round_up(Cout, 256 if Cout > 128 else 128)
    Wp = _round_up(W, 8)              # row pitch multiple of 8 -> aligned taps

    # For small Cin, pack the KW taps into the channel dim: raises MXU K from
    # Cin to KW*Cin and leaves KH taps whose offsets (kh*Wp) are 8-aligned,
    # so every per-tap slice is a cheap view (no sublane-shifted VMEM copy).
    pack_kw = Cin <= 64
    x_nhwc = jnp.transpose(x, (0, 2, 3, 1))             # (N, H, W, Cin)
    if pack_kw:
        Kdim, n_taps = KW * Cin, KH
        tap_offsets = tuple(kh * Wp for kh in range(KH))
        xw = jnp.pad(x_nhwc, ((0, 0), (0, 0), (0, Wp + KW - 1 - W), (0, 0)))
        x_rows = jnp.concatenate([xw[:, :, kw:kw + Wp, :] for kw in range(KW)],
                                 axis=-1)               # (N, H, Wp, KW*Cin)
        w_taps = jnp.transpose(weight, (2, 3, 1, 0)).reshape(KH, KW * Cin, Cout)
        halo = (KH - 1) * Wp
    else:
        Kdim, n_taps = Cin, KH * KW
        tap_offsets = tuple(kh * Wp + kw for kh in range(KH) for kw in range(KW))
        x_rows = jnp.pad(x_nhwc, ((0, 0), (0, 0), (0, Wp - W), (0, 0)))
        w_taps = jnp.transpose(weight, (2, 3, 1, 0)).reshape(KH * KW, Cin, Cout)
        halo = (KH - 1) * Wp + (KW - 1)
        # TODO(synk): kw-offsets are not 8-aligned on this path; large-Cin
        # layers would benefit from a halo-DMA row tiling instead.

    r_valid = OH * Wp                 # output rows (pitch Wp); ow >= OW is junk
    tm = max(_SUB_TM, min(_round_up(tm, _SUB_TM), _round_up(r_valid, _SUB_TM)))
    n_sub = tm // _SUB_TM
    rows = _round_up(r_valid, tm)
    hwp = rows + halo                 # every tap slice stays in-bounds

    x_rows = x_rows.reshape(N, H * Wp, Kdim)
    x_rows = jnp.pad(x_rows, ((0, 0), (0, hwp - H * Wp), (0, 0))).astype(jnp.bfloat16)
    w_taps = jnp.pad(w_taps, ((0, 0), (0, 0), (0, cout_pad - Cout))).astype(jnp.bfloat16)
    b_row = jnp.pad(bias.astype(jnp.float32), (0, cout_pad - Cout)).reshape(1, cout_pad)

    # ---- VMEM budget (lane padding of small Kdim accounted for) ------------
    x_blk = _round_up(hwp, 16) * _round_up(Kdim, _LANE) * 2          # bf16
    w_blk = n_taps * _round_up(Kdim, 16) * cout_pad * 2              # bf16
    o_blk = _round_up(tm, 16) * cout_pad * 2                         # bf16
    b_blk = 8 * cout_pad * 4
    big_w = w_blk > 2 * _MIB
    w_bufs = 1 if big_w else 2
    est_vmem = (2 * x_blk + w_bufs * (w_blk + b_blk) + 2 * o_blk
                + 2 * _SUB_TM * cout_pad * 4)                        # acc/staging

    try:
        vmem_cap = int(pltpu.get_tpu_info().vmem_capacity_bytes)
    except Exception:
        vmem_cap = 64 * _MIB                                         # v7x per-core
    vmem_limit = min(max(int(est_vmem * 5 // 4), 32 * _MIB),
                     int(vmem_cap * 3 // 4))
    # TODO(synk): if est_vmem still exceeds the cap (huge channels/images on
    # v7x), add a Cout grid axis and row-tile x with a manual halo DMA.

    const_spec = {}
    if big_w:
        # Constant-index blocks need no double buffering -> saves VMEM at
        # large channel counts.
        const_spec = dict(pipeline_mode=pl.Buffered(1))

    flops = 2 * N * rows * n_taps * Kdim * cout_pad
    bytes_accessed = int(x_rows.size * 2 + w_taps.size * 2 + b_row.size * 4
                         + N * rows * cout_pad * 2)

    grid = (N, rows // tm)
    out = pl.pallas_call(
        functools.partial(_snconv_kernel, tap_offsets=tap_offsets,
                          sub_tm=_SUB_TM, n_sub=n_sub),
        out_shape=jax.ShapeDtypeStruct((N, rows, cout_pad), jnp.bfloat16),
        grid_spec=pl.GridSpec(
            grid=grid,
            in_specs=[
                pl.BlockSpec(memory_space=pltpu.MemorySpace.SMEM),        # 1/sigma
                pl.BlockSpec((1, hwp, Kdim), lambda n, t: (n, 0, 0)),     # x rows
                pl.BlockSpec((n_taps, Kdim, cout_pad),
                             lambda n, t: (0, 0, 0), **const_spec),       # weights
                pl.BlockSpec((1, cout_pad), lambda n, t: (0, 0),
                             **const_spec),                               # bias
            ],
            out_specs=pl.BlockSpec((1, tm, cout_pad), lambda n, t: (n, t, 0)),
        ),
        compiler_params=pltpu.CompilerParams(
            dimension_semantics=("parallel", "parallel"),
            vmem_limit_bytes=vmem_limit),
        cost_estimate=pl.CostEstimate(flops=flops, transcendentals=0,
                                      bytes_accessed=bytes_accessed),
    )(inv_sigma, x_rows, w_taps, b_row)

    # rows r = oh*Wp + ow; keep oh < OH, ow < OW, drop Cout padding.  The crop
    # + NCHW transpose + final cast fuse into a single XLA post-pass.
    y = out[:, :OH * Wp, :Cout].reshape(N, OH, Wp, Cout)[:, :, :OW, :]
    # TODO(synk): NHWC consumers can skip this final layout transpose.
    y = jnp.transpose(y, (0, 3, 1, 2)).astype(out_dtype)
    return y, u_new


# ---------------------------------------------------------------------------
if __name__ == "__main__":
    key = jax.random.PRNGKey(0)
    kx, kw_, kb, ku = jax.random.split(key, 4)

    N, Cin, H, W = 2, 4, 16, 16
    Cout, K = 8, 3

    x = jax.random.normal(kx, (N, Cin, H, W), jnp.float32)
    weight = jax.random.normal(kw_, (Cout, Cin, K, K), jnp.float32) * 0.1
    bias = jax.random.normal(kb, (Cout,), jnp.float32) * 0.1
    u0 = jax.random.normal(ku, (Cout,), jnp.float32)
    u0 = u0 / jnp.maximum(jnp.linalg.norm(u0), EPS)

    fwd = jax.jit(snconv2d_forward)
    y, u_new = fwd(x, weight, bias, u0)
    y = jax.block_until_ready(y)

    # --- pure-JAX reference (power iteration + conv); x / weight rounded to
    #     bf16 like the kernel's MXU inputs, accumulation in f32 -------------
    w_mat = weight.reshape(Cout, -1)
    v = w_mat.T @ u0
    v = v / jnp.maximum(jnp.linalg.norm(v), EPS)
    u1 = w_mat @ v
    u1 = u1 / jnp.maximum(jnp.linalg.norm(u1), EPS)
    sigma_ref = u1 @ (w_mat @ v)

    xb = x.astype(jnp.bfloat16).astype(jnp.float32)
    wb = weight.astype(jnp.bfloat16).astype(jnp.float32)
    y_ref = lax.conv_general_dilated(
        xb, wb, window_strides=(1, 1), padding="VALID",
        dimension_numbers=("NCHW", "OIHW", "NCHW"),
        precision=lax.Precision.HIGHEST,
    ) * (1.0 / jnp.maximum(sigma_ref, EPS)) + bias.reshape(1, Cout, 1, 1)

    assert y.shape == (N, Cout, H - K + 1, W - K + 1), y.shape
    assert jnp.allclose(u_new, u1, atol=1e-5, rtol=1e-5), "u mismatch"
    # kernel emits bf16 (one extra rounding vs. the f32 reference)
    assert jnp.allclose(y, y_ref, atol=2e-2, rtol=2e-2), \
        float(jnp.max(jnp.abs(y - y_ref)))
    print("KERNEL_OK")
</pallas_src>

<mosaic_0001>
module attributes {stable_mosaic.version = 11 : i64} {
  func.func @_snconv_kernel(%arg0: i32, %arg1: i32, %arg2: memref<1x1xf32, #tpu.memory_space<smem>>, %arg3: memref<1x288x12xbf16, #tpu.memory_space<vmem>>, %arg4: memref<3x12x128xbf16, #tpu.memory_space<vmem>>, %arg5: memref<1x128xf32, #tpu.memory_space<vmem>>, %arg6: memref<1x256x128xbf16, #tpu.memory_space<vmem>>) attributes {dimension_semantics = [#tpu.dimension_semantics<parallel>, #tpu.dimension_semantics<parallel>], iteration_bounds = array<i64: 2, 1>, scalar_prefetch = 0 : i64, scratch_operands = 0 : i64, tpu.core_type = #tpu.core_type<tc>, window_params = [{transform_indices = @transform_0, window_bounds = array<i64: 1, 1>}, {transform_indices = @transform_1, window_bounds = array<i64: 1, 288, 12>}, {pipeline_mode = #tpu.pipeline_mode<synchronous>, transform_indices = @transform_2, window_bounds = array<i64: 3, 12, 128>}, {pipeline_mode = #tpu.pipeline_mode<synchronous>, transform_indices = @transform_3, window_bounds = array<i64: 1, 128>}, {transform_indices = @transform_4, window_bounds = array<i64: 1, 256, 128>}]} {
    %c256_i32 = arith.constant 256 : i32
    %0 = arith.muli %arg1, %c256_i32 : i32
    %1 = tpu.assume_multiple %0, 8 : i32
    %c0 = arith.constant 0 : index
    %c0_0 = arith.constant 0 : index
    %2 = memref.load %arg2[%c0, %c0_0] : memref<1x1xf32, #tpu.memory_space<smem>>
    %c0_1 = arith.constant 0 : index
    %c0_2 = arith.constant 0 : index
    %3 = vector.load %arg5[%c0_1, %c0_2] : memref<1x128xf32, #tpu.memory_space<vmem>>, vector<1x128xf32>
    %c0_i32 = arith.constant 0 : i32
    %c2_i32 = arith.constant 2 : i32
    %4 = arith.addi %c0_i32, %c2_i32 : i32
    %c1_i32 = arith.constant 1 : i32
    scf.for %arg7 = %c0_i32 to %4 step %c1_i32  : i32 {
      %c128_i32 = arith.constant 128 : i32
      %5 = arith.muli %arg7, %c128_i32 : i32
      %6 = tpu.assume_multiple %5, 8 : i32
      %7 = arith.addi %1, %6 : i32
      %c0_i32_4 = arith.constant 0 : i32
      %8 = arith.addi %7, %c0_i32_4 : i32
      %9 = tpu.assume_multiple %8, 8 : i32
      %c0_5 = arith.constant 0 : index
      %10 = arith.index_cast %9 : i32 to index
      %c0_6 = arith.constant 0 : index
      %11 = vector.load %arg3[%c0_5, %10, %c0_6] : memref<1x288x12xbf16, #tpu.memory_space<vmem>>, vector<1x128x12xbf16>
      %12 = vector.shape_cast %11 : vector<1x128x12xbf16> to vector<128x12xbf16>
      %c0_7 = arith.constant 0 : index
      %c0_8 = arith.constant 0 : index
      %c0_9 = arith.constant 0 : index
      %13 = vector.load %arg4[%c0_7, %c0_8, %c0_9] : memref<3x12x128xbf16, #tpu.memory_space<vmem>>, vector<1x12x128xbf16>
      %14 = vector.shape_cast %13 : vector<1x12x128xbf16> to vector<12x128xbf16>
      %cst = arith.constant dense<0.000000e+00> : vector<128x128xf32>
      %15 = tpu.matmul %12, %14, %cst {dimension_numbers = #tpu.dot_dimension_numbers<[1], [0], [0], [1], [0, 0, 1, 1], [], []>} : vector<128x12xbf16>, vector<12x128xbf16>, vector<128x128xf32> -> vector<128x128xf32>
      %c16_i32 = arith.constant 16 : i32
      %16 = arith.addi %7, %c16_i32 : i32
      %17 = tpu.assume_multiple %16, 8 : i32
      %c0_10 = arith.constant 0 : index
      %18 = arith.index_cast %17 : i32 to index
      %c0_11 = arith.constant 0 : index
      %19 = vector.load %arg3[%c0_10, %18, %c0_11] : memref<1x288x12xbf16, #tpu.memory_space<vmem>>, vector<1x128x12xbf16>
      %20 = vector.shape_cast %19 : vector<1x128x12xbf16> to vector<128x12xbf16>
      %c1 = arith.constant 1 : index
      %c0_12 = arith.constant 0 : index
      %c0_13 = arith.constant 0 : index
      %21 = vector.load %arg4[%c1, %c0_12, %c0_13] : memref<3x12x128xbf16, #tpu.memory_space<vmem>>, vector<1x12x128xbf16>
      %22 = vector.shape_cast %21 : vector<1x12x128xbf16> to vector<12x128xbf16>
      %cst_14 = arith.constant dense<0.000000e+00> : vector<128x128xf32>
      %23 = tpu.matmul %20, %22, %cst_14 {dimension_numbers = #tpu.dot_dimension_numbers<[1], [0], [0], [1], [0, 0, 1, 1], [], []>} : vector<128x12xbf16>, vector<12x128xbf16>, vector<128x128xf32> -> vector<128x128xf32>
      %24 = arith.addf %15, %23 : vector<128x128xf32>
      %c32_i32 = arith.constant 32 : i32
      %25 = arith.addi %7, %c32_i32 : i32
      %26 = tpu.assume_multiple %25, 8 : i32
      %c0_15 = arith.constant 0 : index
      %27 = arith.index_cast %26 : i32 to index
      %c0_16 = arith.constant 0 : index
      %28 = vector.load %arg3[%c0_15, %27, %c0_16] : memref<1x288x12xbf16, #tpu.memory_space<vmem>>, vector<1x128x12xbf16>
      %29 = vector.shape_cast %28 : vector<1x128x12xbf16> to vector<128x12xbf16>
      %c2 = arith.constant 2 : index
      %c0_17 = arith.constant 0 : index
      %c0_18 = arith.constant 0 : index
      %30 = vector.load %arg4[%c2, %c0_17, %c0_18] : memref<3x12x128xbf16, #tpu.memory_space<vmem>>, vector<1x12x128xbf16>
      %31 = vector.shape_cast %30 : vector<1x12x128xbf16> to vector<12x128xbf16>
      %cst_19 = arith.constant dense<0.000000e+00> : vector<128x128xf32>
      %32 = tpu.matmul %29, %31, %cst_19 {dimension_numbers = #tpu.dot_dimension_numbers<[1], [0], [0], [1], [0, 0, 1, 1], [], []>} : vector<128x12xbf16>, vector<12x128xbf16>, vector<128x128xf32> -> vector<128x128xf32>
      %33 = arith.addf %24, %32 : vector<128x128xf32>
      %34 = vector.broadcast %2 : f32 to vector<128x128xf32>
      %35 = arith.mulf %33, %34 : vector<128x128xf32>
      %36 = vector.broadcast %3 : vector<1x128xf32> to vector<128x128xf32>
      %37 = arith.addf %35, %36 : vector<128x128xf32>
      %38 = arith.truncf %37 : vector<128x128xf32> to vector<128x128xbf16>
      %c0_20 = arith.constant 0 : index
      %39 = arith.index_cast %6 : i32 to index
      %c0_21 = arith.constant 0 : index
      %40 = vector.load %arg6[%c0_20, %39, %c0_21] : memref<1x256x128xbf16, #tpu.memory_space<vmem>>, vector<1x128x128xbf16>
      %41 = vector.shape_cast %40 : vector<1x128x128xbf16> to vector<128x128xbf16>
      %42 = vector.shape_cast %38 : vector<128x128xbf16> to vector<1x128x128xbf16>
      tpu.vector_store %arg6[%c0_20, %39, %c0_21], %42 {strides = array<i32>} : memref<1x256x128xbf16, #tpu.memory_space<vmem>>, vector<1x128x128xbf16>,
    }
    %c2_i32_3 = arith.constant 2 : i32
    return
  }
  func.func @transform_0(%arg0: i32, %arg1: i32) -> (i32, i32) {
    %c0_i32 = arith.constant 0 : i32
    %c0_i32_0 = arith.constant 0 : i32
    %c0_i32_1 = arith.constant 0 : i32
    return %c0_i32, %c0_i32_0 : i32, i32
  }
  func.func @transform_1(%arg0: i32, %arg1: i32) -> (i32, i32, i32) {
    %c0_i32 = arith.constant 0 : i32
    %c0_i32_0 = arith.constant 0 : i32
    %c0_i32_1 = arith.constant 0 : i32
    return %arg0, %c0_i32, %c0_i32_0 : i32, i32, i32
  }
  func.func @transform_2(%arg0: i32, %arg1: i32) -> (i32, i32, i32) {
    %c0_i32 = arith.constant 0 : i32
    %c0_i32_0 = arith.constant 0 : i32
    %c0_i32_1 = arith.constant 0 : i32
    %c0_i32_2 = arith.constant 0 : i32
    return %c0_i32, %c0_i32_0, %c0_i32_1 : i32, i32, i32
  }
  func.func @transform_3(%arg0: i32, %arg1: i32) -> (i32, i32) {
    %c0_i32 = arith.constant 0 : i32
    %c0_i32_0 = arith.constant 0 : i32
    %c0_i32_1 = arith.constant 0 : i32
    return %c0_i32, %c0_i32_0 : i32, i32
  }
  func.func @transform_4(%arg0: i32, %arg1: i32) -> (i32, i32, i32) {
    %c0_i32 = arith.constant 0 : i32
    %c0_i32_0 = arith.constant 0 : i32
    return %arg0, %arg1, %c0_i32 : i32, i32, i32
  }
}

</mosaic_0001>

<bundles_post_ra>
// kernel: snconv2d_forward.1
= control target key start
LH: loop header
LB: loop body
LE: loop exit
PB: predicated region body
PF: predicated region fallthrough
CT: control target
= control target key end

     0   :  { %s1436_s17 = smov 0   ;;  %s1438_s18 = smov 0   ;;  %s1612_s0 = inlined_call_operand.<no memory space> [shape: f32[1,1], index: 0, kind: input, shape index: {}]   ;;  %s1613_s1 = inlined_call_operand.vmem [shape: bf16[2,288,12], index: 1, kind: input, shape index: {}]   ;;  %s1614_s2 = inlined_call_operand.vmem [shape: bf16[3,12,128], index: 2, kind: input, shape index: {}]   ;;  %s1615_s3 = inlined_call_operand.vmem [shape: f32[1,128], index: 3, kind: input, shape index: {}]   ;;  %s1616_s4 = inlined_call_operand.vmem [shape: bf16[2,256,128], index: 4, kind: output, shape index: {}]  }
   0x1   :  { %9 = sst [smem:[#allocation2]] %s1612_s0  ;;  %s1440_s19 = smov 0  }
   0x2 LB: > { %s27_s0 = sadd.s32 1, %s1398_s18  ;;  %p1050_p0 = scmp.ge.s32.totalorder %s1402_s19, 1  ;;  %s1402_s19 = sphi %s1440_s19, %s15_s19   ;;  %s1398_s18 = sphi %s1438_s18, %s1618_s18   ;;  %s1394_s17 = sphi %s1436_s17, %s1617_s17  }
   0x3   : > { %p29_p1 = scmp.ge.s32.totalorder %s27_s0, 2  ;;  %p177_p2 = scmp.lt.s32.totalorder %s1402_s19, 3 }
   0x5   : > { %s1620_s0 = smov (%p29_p1, %s27_s0), 0  ;;  %p178_p3 = pnand %p1050_p0, %p177_p2 }
   0x6   : > { %p207_p4 = scmp.lt.s32.totalorder (!%p178_p3), %s1394_s17, 1  ;;  %s1454_s20 = sld [smem:[#allocation2]] (!%p178_p3)  ;;  %v1459_v0 = vld [vmem:[%s1615_s3] ss:$0 sm:$0xff] (!%p178_p3) }
   0x7   : > { %181 = sbr.rel (%p178_p3) target bundleno = 291 (0x123), region = 36  ;;  %s1471_s5 = smov (!%p178_p3), 0  }
   0xe   : > { %s1622_s17 = smov (!%p207_p4, %s1394_s17), 1 }
   0xf   : > { %s1316_s23 = smul.u32 144, %s1622_s17  ;;  %s1133_s24 = sshll.u32 %s1622_s17, 7 }
  0x10   : > { %s1464_s27 = scalar_lea.vmem %s1616_s4, %s1133_s24 }
  0x11   : > { %s1469_s30 = scalar_lea.vmem %s1613_s1, %s1316_s23 }
  0x12 LB: >> { %v1349_v1 = vld [vmem:[%s1614_s2 + $0x8] sm:$0x3f]   ;;  %vm350_vm0 = vcmask 1045504   ;;  %v1350_v2 = vld [vmem:[%s1614_s2] sm:$0x3f]   ;;  %s1054_s10 = sshll.u32 %s1406_s5, 7  ;;  %v1554_v40 = vstv %s1454_s20  ;;  %s1406_s5 = sphi %s1471_s5, %s231_s5  }
  0x13   : >> { %1312 = vmatprep.subr.msk.bf16.mxu1 %vm350_vm0, %v1349_v1  ;;  %v352_v3 = vsel %vm350_vm0, %v1349_v1, 0  ;;  %s234_s11 = sshra.s32 %s1054_s10, 3  ;;  %s620_s12 = sadd.s32 32, %s1054_s10  ;;  %v1354_v4 = vld [vmem:[%s1614_s2 + $0x10] sm:$0x3f]   ;;  %1313 = vmatprep.subr.msk.bf16.mxu0 %vm350_vm0, %v1350_v2  ;;  %v521_v5 = vsel %vm350_vm0, %v1350_v2, 0 }
  0x14   : >> { %1225 = vmatpush3.bf16.msra.mxu1 %v352_v3  ;;  %s1490_s15 = sshll.u32 %s234_s11, 2  ;;  %s621_s16 = sshra.s32 %s620_s12, 3  ;;  %1243 = vmatpush3.bf16.msra.mxu0 %v521_v5  ;;  %vm325_vm1 = vcmask 97280   ;;  %v714_v6 = vsel %vm350_vm0, %v1354_v4, 0 }
  0x15   : >> { %1314 = vmatprep.subr.msk.bf16.mxu1 %vm350_vm0, %v1350_v2  ;;  %s1495_s17 = scalar_lea.vmem %s1469_s30, %s1490_s15  ;;  %s256_s21 = sadd.s32 16, %s1054_s10  ;;  %1315 = vmatprep.subr.msk.bf16.mxu0 %vm350_vm0, %v1354_v4 }
  0x16   : >> { %v1351_v7 = vld [vmem:[%s1495_s17] sm:$0xff]   ;;  %s257_s22 = sshra.s32 %s256_s21, 3  ;;  %v1353_v8 = vld [vmem:[%s1495_s17 + $0x8] sm:$0xff]   ;;  %v1356_v9 = vld [vmem:[%s1495_s17 + $0x10] sm:$0xff]   ;;  %s1093_s25 = sshll.u32 %s621_s16, 2 }
  0x17   : >> { %s1056_s23 = sshll.u32 %s257_s22, 2  ;;  %1244 = vmatprep.mubr.msk.bf16.mxu0 %vm325_vm1, %v1351_v7  ;;  %s1513_s26 = scalar_lea.vmem %s1469_s30, %s1093_s25  ;;  %v1358_v13 = vld [vmem:[%s1495_s17 + $0x18] sm:$0xff]   ;;  %v1369_v24 = vld [vmem:[%s1495_s17 + $0x20] sm:$0xff]   ;;  %v1371_v27 = vld [vmem:[%s1495_s17 + $0x28] sm:$0xff]  }
  0x18   : >> { %s1503_s24 = scalar_lea.vmem %s1469_s30, %s1056_s23  ;;  %1245 = vmatmul.mubr.msk.bf16.vlgmr.msra.gmra.mrb[0].mxu0 %vm325_vm1, %v1353_v8  ;;  %v1360_v14 = vld [vmem:[%s1513_s26] sm:$0xff]   ;;  %v1362_v17 = vld [vmem:[%s1513_s26 + $0x8] sm:$0xff]   ;;  %v1364_v18 = vld [vmem:[%s1513_s26 + $0x10] sm:$0xff]   ;;  %s1565_s28 = scalar_lea.vmem %s1464_s27, %s1490_s15 }
  0x19   : >> { %v1352_v10 = vld [vmem:[%s1503_s24] sm:$0xff]   ;;  %v1355_v11 = vld [vmem:[%s1503_s24 + $0x8] sm:$0xff]   ;;  %1261 = vmatpush3.bf16.msra.mxu0 %v714_v6  ;;  %1248 = vmatprep.mubr.msk.bf16.mxu0 %vm325_vm1, %v1356_v9  ;;  %v1357_v12 = vld [vmem:[%s1503_s24 + $0x10] sm:$0xff]   ;;  %s231_s5 = sadd.s32 1, %s1406_s5  }
  0x1a   : >> { %1226 = vmatprep.mubr.msk.bf16.mxu1 %vm325_vm1, %v1352_v10  ;;  %v1359_v15 = vld [vmem:[%s1503_s24 + $0x18] sm:$0xff]   ;;  %v1361_v16 = vld [vmem:[%s1503_s24 + $0x20] sm:$0xff]   ;;  %v1363_v19 = vld [vmem:[%s1503_s24 + $0x28] sm:$0xff]   ;;  %p228_p5 = scmp.ge.s32.totalorder %s231_s5, 2  }
  0x1b   : >> { %1227 = vmatmul.mubr.msk.bf16.vlgmr.msra.gmra.mrb[0].mxu1 %vm325_vm1, %v1355_v11  ;;  %v1365_v20 = vld [vmem:[%s1503_s24 + $0x30] sm:$0xff]   ;;  %v1366_v21 = vld [vmem:[%s1513_s26 + $0x18] sm:$0xff]   ;;  %v1368_v22 = vld [vmem:[%s1513_s26 + $0x20] sm:$0xff]  }
  0x1c   : >> { %1279 = vmatpush3.bf16.msra.mxu1 %v521_v5  ;;  %1230 = vmatprep.mubr.msk.bf16.mxu1 %vm325_vm1, %v1357_v12  ;;  %v1367_v23 = vld [vmem:[%s1503_s24 + $0x38] sm:$0xff]   ;;  %v1370_v25 = vld [vmem:[%s1513_s26 + $0x28] sm:$0xff]   ;;  %v1372_v26 = vld [vmem:[%s1513_s26 + $0x30] sm:$0xff]  }
  0x1d   : >> { %v1373_v28 = vld [vmem:[%s1495_s17 + $0x30] sm:$0xff]   ;;  %v1374_v29 = vld [vmem:[%s1513_s26 + $0x38] sm:$0xff]  }
  0x1e   : >> { %v1375_v30 = vld [vmem:[%s1495_s17 + $0x38] sm:$0xff]  }
  0x20   : >> { %1249 = vmatmul.mubr.msk.bf16.gmra.mrb[4].mxu0 %vm325_vm1, %v1358_v13 }
  0x21   : >> { %1262 = vmatprep.mubr.msk.bf16.mxu0 %vm325_vm1, %v1360_v14 }
  0x23   : >> { %1231 = vmatmul.mubr.msk.bf16.gmra.mrb[4].mxu1 %vm325_vm1, %v1359_v15 }
  0x24   : >> { %1234 = vmatprep.mubr.msk.bf16.mxu1 %vm325_vm1, %v1361_v16 }
  0x28   : >> { %1263 = vmatmul.mubr.msk.bf16.vlgmr.msra.gmra.mrb[0].mxu0 %vm325_vm1, %v1362_v17 }
  0x29   : >> { %1266 = vmatprep.mubr.msk.bf16.mxu0 %vm325_vm1, %v1364_v18 }
  0x2b   : >> { %1235 = vmatmul.mubr.msk.bf16.gmra.mrb[8].mxu1 %vm325_vm1, %v1363_v19 }
  0x2c   : >> { %1238 = vmatprep.mubr.msk.bf16.mxu1 %vm325_vm1, %v1365_v20 }
  0x30   : >> { %1267 = vmatmul.mubr.msk.bf16.gmra.mrb[4].mxu0 %vm325_vm1, %v1366_v21 }
  0x31   : >> { %1270 = vmatprep.mubr.msk.bf16.mxu0 %vm325_vm1, %v1368_v22 }
  0x33   : >> { %1239 = vmatmul.mubr.msk.bf16.gmra.mrb[12].mxu1 %vm325_vm1, %v1367_v23 }
  0x34   : >> { %1252 = vmatprep.mubr.msk.bf16.mxu1 %vm325_vm1, %v1369_v24 }
  0x38   : >> { %1271 = vmatmul.mubr.msk.bf16.gmra.mrb[8].mxu0 %vm325_vm1, %v1370_v25 }
  0x39   : >> { %1274 = vmatprep.mubr.msk.bf16.mxu0 %vm325_vm1, %v1372_v26 }
  0x3b   : >> { %1253 = vmatmul.mubr.msk.bf16.vlgmr.msra.gmra.mrb[8].mxu1 %vm325_vm1, %v1371_v27 }
  0x3c   : >> { %1256 = vmatprep.mubr.msk.bf16.mxu1 %vm325_vm1, %v1373_v28 }
  0x40   : >> { %1275 = vmatmul.mubr.msk.bf16.gmra.mrb[12].mxu0 %vm325_vm1, %v1374_v29 }
  0x43   : >> { %1257 = vmatmul.mubr.msk.bf16.gmra.mrb[12].mxu1 %vm325_vm1, %v1375_v30 }
  0xee   : >> { %v1228_v31 = vpop.f32.mrb[0].mxu1 }
  0xef   : >> { %v388_v32 = vpop.f32.mrb[1].mxu1 }
  0xf0   : >> { %v1229_v33 = vpop.f32.mrb[2].mxu1 }
  0xf1   : >> { %v391_v34 = vpop.f32.mrb[3].mxu1 }
  0xf6   : >> { %v1232_v35 = vpop.f32.mrb[4].mxu1 }
  0xf7   : >> { %v404_v36 = vpop.f32.mrb[5].mxu1 }
  0xf8   : >> { %v1233_v37 = vpop.f32.mrb[6].mxu1 }
  0xf9   : >> { %v407_v38 = vpop.f32.mrb[7].mxu1 }
  0xfb   : >> { %v1264_v39 = vpop.f32.mrb[0].mxu0 }
  0xfc   : >> { %v1280_v41 = vadd.f32 %v1264_v39, %v1228_v31  ;;  %v750_v42 = vpop.f32.mrb[1].mxu0 }
  0xfd   : >> { %v1281_v43 = vadd.f32 %v750_v42, %v388_v32  ;;  %v1265_v44 = vpop.f32.mrb[2].mxu0 }
  0xfe   : >> { %v832_v45 = vmul.f32 %v1280_v41, %v1554_v40  ;;  %v1282_v46 = vadd.f32 %v1265_v44, %v1229_v33  ;;  %v753_v47 = vpop.f32.mrb[3].mxu0 }
  0xff   : >> { %v830_v48 = vmul.f32 %v1281_v43, %v1554_v40  ;;  %v1283_v49 = vadd.f32 %v753_v47, %v391_v34 }
 0x100   : >> { %v833_v50 = vmul.f32 %v1282_v46, %v1554_v40  ;;  %v854_v52 = vadd.f32 %v1459_v0, %v832_v45 }
 0x101   : >> { %v831_v51 = vmul.f32 %v1283_v49, %v1554_v40  ;;  %v852_v54 = vadd.f32 %v1459_v0, %v830_v48 }
 0x102   : >> { %v855_v53 = vadd.f32 %v1459_v0, %v833_v50 }
 0x103   : >> { %v853_v55 = vadd.f32 %v1459_v0, %v831_v51  ;;  %v1268_v56 = vpop.f32.mrb[4].mxu0 }
 0x104   : >> { %v1158_v57 = vpack.c.bf16 %v855_v53, %v854_v52  ;;  %v1284_v58 = vadd.f32 %v1268_v56, %v1232_v35  ;;  %v766_v59 = vpop.f32.mrb[5].mxu0 }
 0x105   : >> { %v1153_v60 = vpack.c.bf16 %v853_v55, %v852_v54  ;;  %v1285_v61 = vadd.f32 %v766_v59, %v404_v36  ;;  %v1269_v62 = vpop.f32.mrb[6].mxu0 }
 0x106   : >> { %1190 = vst [vmem:[%s1565_s28 + $0x8] sm:$0xff] %v1158_v57   ;;  %v836_v63 = vmul.f32 %v1284_v58, %v1554_v40  ;;  %v1286_v1 = vadd.f32 %v1269_v62, %v1233_v37  ;;  %v769_v2 = vpop.f32.mrb[7].mxu0 }
 0x107   : >> { %1154 = vst [vmem:[%s1565_s28] sm:$0xff] %v1153_v60   ;;  %v834_v3 = vmul.f32 %v1285_v61, %v1554_v40  ;;  %v1287_v4 = vadd.f32 %v769_v2, %v407_v38 }
 0x108   : >> { %v837_v5 = vmul.f32 %v1286_v1, %v1554_v40  ;;  %v858_v7 = vadd.f32 %v1459_v0, %v836_v63 }
 0x109   : >> { %v835_v6 = vmul.f32 %v1287_v4, %v1554_v40  ;;  %v856_v9 = vadd.f32 %v1459_v0, %v834_v3 }
 0x10a   : >> { %v859_v8 = vadd.f32 %v1459_v0, %v837_v5 }
 0x10b   : >> { %v857_v10 = vadd.f32 %v1459_v0, %v835_v6  ;;  %v1272_v11 = vpop.f32.mrb[8].mxu0 }
 0x10c   : >> { %v1168_v12 = vpack.c.bf16 %v859_v8, %v858_v7  ;;  %v782_v13 = vpop.f32.mrb[9].mxu0 }
 0x10d   : >> { %v1163_v14 = vpack.c.bf16 %v857_v10, %v856_v9  ;;  %v1273_v15 = vpop.f32.mrb[10].mxu0 }
 0x10e   : >> { %1192 = vst [vmem:[%s1565_s28 + $0x18] sm:$0xff] %v1168_v12   ;;  %v1254_v16 = vpop.f32.mrb[8].mxu1  ;;  %v785_v17 = vpop.f32.mrb[11].mxu0 }
 0x10f   : >> { %1191 = vst [vmem:[%s1565_s28 + $0x10] sm:$0xff] %v1163_v14   ;;  %v1288_v18 = vadd.f32 %v1272_v11, %v1254_v16  ;;  %v589_v19 = vpop.f32.mrb[9].mxu1 }
 0x110   : >> { %v1289_v20 = vadd.f32 %v782_v13, %v589_v19  ;;  %v1255_v21 = vpop.f32.mrb[10].mxu1 }
 0x111   : >> { %v840_v22 = vmul.f32 %v1288_v18, %v1554_v40  ;;  %v1290_v23 = vadd.f32 %v1273_v15, %v1255_v21  ;;  %v592_v24 = vpop.f32.mrb[11].mxu1 }
 0x112   : >> { %v838_v25 = vmul.f32 %v1289_v20, %v1554_v40  ;;  %v1291_v26 = vadd.f32 %v785_v17, %v592_v24 }
 0x113   : >> { %v841_v27 = vmul.f32 %v1290_v23, %v1554_v40  ;;  %v1276_v28 = vpop.f32.mrb[12].mxu0  ;;  %v862_v31 = vadd.f32 %v1459_v0, %v840_v22 }
 0x114   : >> { %v839_v29 = vmul.f32 %v1291_v26, %v1554_v40  ;;  %v798_v30 = vpop.f32.mrb[13].mxu0  ;;  %v860_v34 = vadd.f32 %v1459_v0, %v838_v25 }
 0x115   : >> { %v863_v32 = vadd.f32 %v1459_v0, %v841_v27  ;;  %v1277_v33 = vpop.f32.mrb[14].mxu0 }
 0x116   : >> { %v861_v35 = vadd.f32 %v1459_v0, %v839_v29  ;;  %v1258_v36 = vpop.f32.mrb[12].mxu1  ;;  %v801_v37 = vpop.f32.mrb[15].mxu0 }
 0x117   : >> { %v1178_v38 = vpack.c.bf16 %v863_v32, %v862_v31  ;;  %v1292_v39 = vadd.f32 %v1276_v28, %v1258_v36  ;;  %v605_v41 = vpop.f32.mrb[13].mxu1 }
 0x118   : >> { %v1173_v42 = vpack.c.bf16 %v861_v35, %v860_v34  ;;  %v1293_v43 = vadd.f32 %v798_v30, %v605_v41  ;;  %v1259_v44 = vpop.f32.mrb[14].mxu1 }
 0x119   : >> { %1194 = vst [vmem:[%s1565_s28 + $0x28] sm:$0xff] %v1178_v38   ;;  %v844_v45 = vmul.f32 %v1292_v39, %v1554_v40  ;;  %v1294_v46 = vadd.f32 %v1277_v33, %v1259_v44  ;;  %v608_v47 = vpop.f32.mrb[15].mxu1 }
 0x11a   : >> { %1193 = vst [vmem:[%s1565_s28 + $0x20] sm:$0xff] %v1173_v42   ;;  %v842_v48 = vmul.f32 %v1293_v43, %v1554_v40  ;;  %v1295_v49 = vadd.f32 %v801_v37, %v608_v47 }
 0x11b   : >> { %v845_v50 = vmul.f32 %v1294_v46, %v1554_v40  ;;  %v866_v52 = vadd.f32 %v1459_v0, %v844_v45 }
 0x11c   : >> { %v843_v51 = vmul.f32 %v1295_v49, %v1554_v40  ;;  %v864_v54 = vadd.f32 %v1459_v0, %v842_v48  ;;  %230 = sbr.rel (!%p228_p5) target bundleno = 18 (0x12), region = 79 }
 0x11d   : >> { %v867_v53 = vadd.f32 %v1459_v0, %v845_v50 }
 0x11e   : >> { %v865_v55 = vadd.f32 %v1459_v0, %v843_v51 }
 0x11f   : >> { %v1188_v56 = vpack.c.bf16 %v867_v53, %v866_v52 }
 0x120   : >> { %v1183_v57 = vpack.c.bf16 %v865_v55, %v864_v54 }
 0x121   : >> { %1196 = vst [vmem:[%s1565_s28 + $0x38] sm:$0xff] %v1188_v56  }
 0x122   : >> { %1195 = vst [vmem:[%s1565_s28 + $0x30] sm:$0xff] %v1183_v57  }
 0x123 PF: > { %s15_s19 = sadd.s32 1, %s1402_s19   ;;  %s1617_s17 = smov %s1398_s18 }
 0x124   : > { %p12_p6 = scmp.ge.s32.totalorder %s15_s19, 4   ;;  %s1618_s18 = smov %s1620_s0 }
 0x126   :  { %14 = sbr.rel (!%p12_p6) target bundleno = 2 (0x2), region = 90 }

</bundles_post_ra>
